<compile_context>
chip_gen: v6e
topology: v6e:2x2x1
jax: 0.10.0
libtpu: 0.0.40
codegen_flags: <defaults>
</compile_context>

<pallas_src>
import jax
import jax.numpy as jnp
from jax.experimental import pallas as pl
from jax.experimental.pallas import tpu as pltpu


def _round_up(n, m):
    return (n + m - 1) // m * m


# ---------------------------------------------------------------------------
# Kernel
# ---------------------------------------------------------------------------
def poisson_decoder_kernel(x_ref, w1_ref, b1_ref, w2_ref, b2_ref, eps_ref,
                           scale_ref, rate_ref, lib_ref):
    out_pad = scale_ref.shape[-1]

    # Stage 1: hidden layer + ReLU.  bf16 MXU inputs, f32 accumulation.
    px = jnp.dot(x_ref[...], w1_ref[...], preferred_element_type=jnp.float32)
    px = jnp.maximum(px + b1_ref[...], 0.0)

    # Stage 2: ONE fused matmul for the scale / library_mean / library_var
    # heads (they share the same LHS).  Lanes [0, out_pad) hold the (padded)
    # gene logits; lanes out_pad / out_pad+1 hold the two library heads.
    y = jnp.dot(px.astype(w2_ref.dtype), w2_ref[...],
                preferred_element_type=jnp.float32) + b2_ref[...]

    # Softmax over the padded gene axis; padded columns carry a -1e30 bias so
    # exp(...) == 0 there and they drop out of the normalization.
    logits = y[:, :out_pad]
    m = jnp.max(logits, axis=-1, keepdims=True)
    p = jnp.exp(logits - m)
    # EUP reciprocal (separate issue slot) instead of a wide VPU divide.
    inv_sum = pl.reciprocal(jnp.sum(p, axis=-1, keepdims=True), approx=True)

    # Library heads (lanes out_pad / out_pad + 1 of the fused output).
    lib_mean = y[:, out_pad:out_pad + 1]
    lib_var = jnp.exp(y[:, out_pad + 1:out_pad + 2]) + 1e-4
    # Reparameterized sample of Normal(lib_mean, sqrt(lib_var)).
    library = lib_mean + jnp.sqrt(lib_var) * eps_ref[...]

    # Keep the per-row scalar math at (tm, 1) width; broadcast only once.
    scale_ref[...] = (p * inv_sum).astype(scale_ref.dtype)
    rate_ref[...] = (p * (inv_sum * jnp.exp(library))).astype(rate_ref.dtype)

    # Pack library_mean / library_var / library into ONE lane-dense (tm, 128)
    # output (lanes 0/1/2) -> a single unmasked store / DMA stream.
    lane = jax.lax.broadcasted_iota(jnp.int32, lib_ref.shape, 1)
    lib_ref[...] = jnp.where(
        lane == 0, lib_mean,
        jnp.where(lane == 1, lib_var,
                  jnp.where(lane == 2, library, 0.0))).astype(lib_ref.dtype)


# ---------------------------------------------------------------------------
# Parameter packing (done ONCE, outside the per-call path)
# ---------------------------------------------------------------------------
def pack_params(w1, b1, w_scale, b_scale, w_lm, b_lm, w_lv, b_lv,
                compute_dtype=jnp.bfloat16):
    """Fuse the three stage-2 heads into one lane-padded weight/bias pair and
    cast the matmul operands to the MXU compute dtype (biases stay f32)."""
    in_dim, hidden = w1.shape
    out_dim = w_scale.shape[1]
    out_pad = _round_up(out_dim, 128)
    n2 = out_pad + 128  # one extra lane group holding the two library heads

    f32 = jnp.float32
    w2 = jnp.zeros((hidden, n2), f32)
    w2 = w2.at[:, :out_dim].set(w_scale.astype(f32))
    w2 = w2.at[:, out_pad].set(w_lm[:, 0].astype(f32))
    w2 = w2.at[:, out_pad + 1].set(w_lv[:, 0].astype(f32))
    b2 = jnp.zeros((1, n2), f32)
    b2 = b2.at[:, :out_dim].set(b_scale.reshape(1, -1).astype(f32))
    b2 = b2.at[:, out_dim:out_pad].set(-1e30)  # mask padded genes out of softmax
    b2 = b2.at[:, out_pad].set(b_lm.reshape(-1)[0].astype(f32))
    b2 = b2.at[:, out_pad + 1].set(b_lv.reshape(-1)[0].astype(f32))

    return {
        'w1': w1.astype(compute_dtype),
        'b1': b1.reshape(1, hidden).astype(f32),
        'w2': w2.astype(compute_dtype),
        'b2': b2,
        'in_dim': in_dim, 'hidden': hidden,
        'out_dim': out_dim, 'out_pad': out_pad, 'n2': n2,
        'compute_dtype': compute_dtype,
    }


# ---------------------------------------------------------------------------
# Tiling / VMEM heuristics
# ---------------------------------------------------------------------------
def _pick_tm(batch, device_kind=None):
    if device_kind is None:
        device_kind = jax.devices()[0].device_kind
    kind = device_kind.lower()
    if batch <= 8:
        return _round_up(max(batch, 1), 8)
    # v5e: 128x128 MXU + 16 MiB default scoped VMEM -> cap at 128.
    # v6e/v7x: 256-row MXU; larger tiles amortize ~0.35 us per-step overhead.
    cap = 128 if 'v5' in kind else 256
    if 'v7' in kind or '7x' in kind:
        # v7x has 2 TensorCores: keep >= 2 grid steps on the "parallel" axis.
        cap = min(cap, max(8, _round_up((batch + 1) // 2, 8)))
    return min(cap, _round_up(batch, 8))


def _vmem_limit_bytes(tm, in_dim, hidden, n2, out_pad, compute_bytes):
    f32b = 4
    # single-buffered resident weights / biases
    weights = (in_dim * hidden + hidden * n2) * compute_bytes + (hidden + n2) * f32b
    # double-buffered per-step input tiles (x, eps) and output tiles
    act_in = 2 * (tm * in_dim * compute_bytes + tm * 128 * f32b)
    act_out = 2 * (2 * tm * out_pad * compute_bytes + tm * 128 * f32b)
    # rough in-kernel f32 temporaries (px, y, p)
    scratch = tm * hidden * f32b + 2 * tm * n2 * f32b
    est = (weights + act_in + act_out + scratch) * 3 // 2 + (4 << 20)
    # TODO(synk): scVI-scale out_dim (20-30k genes) needs a gene-axis grid with a
    # two-pass/online softmax to fit v7x's 64 MiB VMEM; not implemented here.
    return int(max(32 << 20, min(est, 100 << 20)))


def _decoder_call(x_p, eps_p, params, tm, b_pad, single_buffer_weights):
    in_dim, hidden = params['in_dim'], params['hidden']
    out_pad, n2 = params['out_pad'], params['n2']
    cdt = params['compute_dtype']
    cbytes = jnp.dtype(cdt).itemsize

    batch_tile = lambda shape: pl.BlockSpec(shape, lambda i: (i, 0))
    if single_buffer_weights:
        # Constant-in-i index_map -> tile stays VMEM-resident across the grid;
        # Buffered(1) drops the useless second pipeline buffer (halves W2 VMEM).
        resident = lambda shape: pl.BlockSpec(shape, lambda i: (0, 0),
                                              pipeline_mode=pl.Buffered(1))
    else:
        resident = lambda shape: pl.BlockSpec(shape, lambda i: (0, 0))

    out_shapes = (
        jax.ShapeDtypeStruct((b_pad, out_pad), cdt),        # px_scale (bf16)
        jax.ShapeDtypeStruct((b_pad, out_pad), cdt),        # px_rate  (bf16)
        jax.ShapeDtypeStruct((b_pad, 128), jnp.float32),    # [lm, lv, lib] packed
    )
    return pl.pallas_call(
        poisson_decoder_kernel,
        out_shape=out_shapes,
        grid=(b_pad // tm,),
        in_specs=[
            batch_tile((tm, in_dim)),      # x   (bf16)
            resident((in_dim, hidden)),    # W1  (bf16)
            resident((1, hidden)),         # b1  (f32)
            resident((hidden, n2)),        # fused W2 (bf16)
            resident((1, n2)),             # fused b2 (f32, holds -1e30 mask)
            batch_tile((tm, 1)),           # eps (rsample noise, f32)
        ],
        out_specs=(
            batch_tile((tm, out_pad)),
            batch_tile((tm, out_pad)),
            batch_tile((tm, 128)),
        ),
        compiler_params=pltpu.CompilerParams(
            dimension_semantics=("parallel",),
            vmem_limit_bytes=_vmem_limit_bytes(tm, in_dim, hidden, n2,
                                               out_pad, cbytes)),
    )(x_p, params['w1'], params['b1'], params['w2'], params['b2'], eps_p)


# ---------------------------------------------------------------------------
# Public wrapper
# ---------------------------------------------------------------------------
def poisson_decoder(x, params, eps, *, tm=None):
    """Fused PoissonDecoder forward (the log_library=None sampling path).

    `params` comes from pack_params(); `eps` is the N(0,1) reparameterization
    noise used for the library rsample.
    """
    # TODO(synk): the forward(x, log_library=...) branch (externally supplied
    # library; library_mean/var returned as None) is not implemented here.
    B = x.shape[0]
    out_dim = params['out_dim']
    cdt = params['compute_dtype']

    if tm is None:
        tm = _pick_tm(B)
    b_pad = _round_up(B, tm)
    x_p = x.astype(cdt)
    eps_p = eps.astype(jnp.float32)
    if b_pad != B:
        x_p = jnp.pad(x_p, ((0, b_pad - B), (0, 0)))
        eps_p = jnp.pad(eps_p, ((0, b_pad - B), (0, 0)))

    try:
        scale_p, rate_p, lib_pack = _decoder_call(
            x_p, eps_p, params, tm, b_pad, single_buffer_weights=True)
    except Exception:
        # Fallback for jax versions without BlockSpec(pipeline_mode=Buffered(1)).
        scale_p, rate_p, lib_pack = _decoder_call(
            x_p, eps_p, params, tm, b_pad, single_buffer_weights=False)

    return {
        'px_scale': scale_p[:B, :out_dim],
        'px_rate': rate_p[:B, :out_dim],
        'library_mean': lib_pack[:B, 0:1],
        'library_var': lib_pack[:B, 1:2],
        'library': lib_pack[:B, 2:3],
        'gene_likelihood': 'poisson',
    }


def init_params(key, in_dim, out_dim, hidden_dim=128):
    """nn.Linear-style init: U(-1/sqrt(fan_in), 1/sqrt(fan_in)), (fan_in, fan_out)."""
    ks = jax.random.split(key, 8)

    def linear(kw, kb, fan_in, fan_out):
        bound = 1.0 / jnp.sqrt(fan_in)
        w = jax.random.uniform(kw, (fan_in, fan_out), jnp.float32, -bound, bound)
        b = jax.random.uniform(kb, (1, fan_out), jnp.float32, -bound, bound)
        return w, b

    w1, b1 = linear(ks[0], ks[1], in_dim, hidden_dim)
    w_scale, b_scale = linear(ks[2], ks[3], hidden_dim, out_dim)
    w_lm, b_lm = linear(ks[4], ks[5], hidden_dim, 1)
    w_lv, b_lv = linear(ks[6], ks[7], hidden_dim, 1)
    return w1, b1, w_scale, b_scale, w_lm, b_lm, w_lv, b_lv


if __name__ == "__main__":
    key = jax.random.PRNGKey(0)
    kx, kp, ke = jax.random.split(key, 3)

    batch, in_dim, hidden_dim, out_dim = 8, 32, 128, 16
    x = jax.random.normal(kx, (batch, in_dim), jnp.float32)
    raw = init_params(kp, in_dim, out_dim, hidden_dim)
    eps = jax.random.normal(ke, (batch, 1), jnp.float32)   # rsample noise

    params = pack_params(*raw)   # head fusion / casts done once, off the call path
    out = poisson_decoder(x, params, eps)
    jax.block_until_ready(out['px_rate'])
    jax.block_until_ready(out['px_scale'])

    # Plain-JAX reference using the same bf16-in / f32-accumulate matmul recipe.
    w1, b1, w_scale, b_scale, w_lm, b_lm, w_lv, b_lv = raw
    bf = params['compute_dtype']
    f32 = jnp.float32
    px = jax.nn.relu(jnp.dot(x.astype(bf), w1.astype(bf),
                             preferred_element_type=f32) + b1)
    px_b = px.astype(bf)
    scale_ref = jax.nn.softmax(
        jnp.dot(px_b, w_scale.astype(bf), preferred_element_type=f32) + b_scale,
        axis=-1)
    lm_ref = jnp.dot(px_b, w_lm.astype(bf), preferred_element_type=f32) + b_lm
    lv_ref = jnp.exp(jnp.dot(px_b, w_lv.astype(bf),
                             preferred_element_type=f32) + b_lv) + 1e-4
    lib_ref = lm_ref + jnp.sqrt(lv_ref) * eps
    rate_ref = jnp.exp(lib_ref) * scale_ref

    # Tolerances cover bf16 outputs + the approximate (EUP) reciprocal.
    assert jnp.allclose(out['px_scale'].astype(f32), scale_ref, atol=8e-3, rtol=2e-2)
    assert jnp.allclose(out['px_rate'].astype(f32), rate_ref, atol=2e-2, rtol=5e-2)
    assert jnp.allclose(out['library_mean'], lm_ref, atol=5e-3, rtol=2e-2)
    assert jnp.allclose(out['library_var'], lv_ref, atol=5e-3, rtol=2e-2)
    assert jnp.allclose(out['library'], lib_ref, atol=5e-3, rtol=2e-2)
    assert out['gene_likelihood'] == 'poisson'

    print("KERNEL_OK")
</pallas_src>

<mosaic_0001>
module attributes {stable_mosaic.version = 11 : i64} {
  func.func @poisson_decoder_kernel(%arg0: i32, %arg1: memref<8x32xbf16, #tpu.memory_space<vmem>>, %arg2: memref<32x128xbf16, #tpu.memory_space<vmem>>, %arg3: memref<1x128xf32, #tpu.memory_space<vmem>>, %arg4: memref<128x256xbf16, #tpu.memory_space<vmem>>, %arg5: memref<1x256xf32, #tpu.memory_space<vmem>>, %arg6: memref<8x1xf32, #tpu.memory_space<vmem>>, %arg7: memref<8x128xbf16, #tpu.memory_space<vmem>>, %arg8: memref<8x128xbf16, #tpu.memory_space<vmem>>, %arg9: memref<8x128xf32, #tpu.memory_space<vmem>>) attributes {dimension_semantics = [#tpu.dimension_semantics<parallel>], iteration_bounds = array<i64: 1>, scalar_prefetch = 0 : i64, scratch_operands = 0 : i64, tpu.core_type = #tpu.core_type<tc>, window_params = [{transform_indices = @transform_0, window_bounds = array<i64: 8, 32>}, {pipeline_mode = #tpu.pipeline_mode<synchronous>, transform_indices = @transform_1, window_bounds = array<i64: 32, 128>}, {pipeline_mode = #tpu.pipeline_mode<synchronous>, transform_indices = @transform_2, window_bounds = array<i64: 1, 128>}, {pipeline_mode = #tpu.pipeline_mode<synchronous>, transform_indices = @transform_3, window_bounds = array<i64: 128, 256>}, {pipeline_mode = #tpu.pipeline_mode<synchronous>, transform_indices = @transform_4, window_bounds = array<i64: 1, 256>}, {transform_indices = @transform_5, window_bounds = array<i64: 8, 1>}, {transform_indices = @transform_6, window_bounds = array<i64: 8, 128>}, {transform_indices = @transform_7, window_bounds = array<i64: 8, 128>}, {transform_indices = @transform_8, window_bounds = array<i64: 8, 128>}]} {
    %c0 = arith.constant 0 : index
    %c0_0 = arith.constant 0 : index
    %0 = vector.load %arg1[%c0, %c0_0] : memref<8x32xbf16, #tpu.memory_space<vmem>>, vector<8x32xbf16>
    %c0_1 = arith.constant 0 : index
    %c0_2 = arith.constant 0 : index
    %1 = vector.load %arg2[%c0_1, %c0_2] : memref<32x128xbf16, #tpu.memory_space<vmem>>, vector<32x128xbf16>
    %cst = arith.constant dense<0.000000e+00> : vector<8x128xf32>
    %2 = tpu.matmul %0, %1, %cst {dimension_numbers = #tpu.dot_dimension_numbers<[1], [0], [0], [1], [0, 0, 1, 1], [], []>} : vector<8x32xbf16>, vector<32x128xbf16>, vector<8x128xf32> -> vector<8x128xf32>
    %c0_3 = arith.constant 0 : index
    %c0_4 = arith.constant 0 : index
    %3 = vector.load %arg3[%c0_3, %c0_4] : memref<1x128xf32, #tpu.memory_space<vmem>>, vector<1x128xf32>
    %4 = vector.broadcast %3 : vector<1x128xf32> to vector<8x128xf32>
    %5 = arith.addf %2, %4 : vector<8x128xf32>
    %cst_5 = arith.constant 0.000000e+00 : f32
    %6 = vector.broadcast %cst_5 : f32 to vector<8x128xf32>
    %7 = arith.maximumf %5, %6 : vector<8x128xf32>
    %8 = arith.truncf %7 : vector<8x128xf32> to vector<8x128xbf16>
    %c0_6 = arith.constant 0 : index
    %c0_7 = arith.constant 0 : index
    %9 = vector.load %arg4[%c0_6, %c0_7] : memref<128x256xbf16, #tpu.memory_space<vmem>>, vector<128x256xbf16>
    %cst_8 = arith.constant dense<0.000000e+00> : vector<8x256xf32>
    %10 = tpu.matmul %8, %9, %cst_8 {dimension_numbers = #tpu.dot_dimension_numbers<[1], [0], [0], [1], [0, 0, 1, 1], [], []>} : vector<8x128xbf16>, vector<128x256xbf16>, vector<8x256xf32> -> vector<8x256xf32>
    %c0_9 = arith.constant 0 : index
    %c0_10 = arith.constant 0 : index
    %11 = vector.load %arg5[%c0_9, %c0_10] : memref<1x256xf32, #tpu.memory_space<vmem>>, vector<1x256xf32>
    %12 = vector.broadcast %11 : vector<1x256xf32> to vector<8x256xf32>
    %13 = arith.addf %10, %12 : vector<8x256xf32>
    %14 = vector.extract_strided_slice %13 {offsets = [0, 0], sizes = [8, 128], strides = [1, 1]} : vector<8x256xf32> to vector<8x128xf32>
    %cst_11 = arith.constant dense<0xFF800000> : vector<8xf32>
    %15 = vector.multi_reduction <maximumf>, %14, %cst_11 [1] : vector<8x128xf32> to vector<8xf32>
    %16 = vector.shape_cast %15 : vector<8xf32> to vector<8x1xf32>
    %17 = vector.broadcast %16 : vector<8x1xf32> to vector<8x128xf32>
    %18 = arith.subf %14, %17 : vector<8x128xf32>
    %19 = math.exp %18 : vector<8x128xf32>
    %cst_12 = arith.constant dense<0.000000e+00> : vector<8xf32>
    %20 = vector.multi_reduction <add>, %19, %cst_12 [1] : vector<8x128xf32> to vector<8xf32>
    %21 = vector.shape_cast %20 : vector<8xf32> to vector<8x1xf32>
    %22 = tpu.reciprocal %21 {approx = true} : vector<8x1xf32> -> vector<8x1xf32>
    %23 = vector.extract_strided_slice %13 {offsets = [0, 128], sizes = [8, 1], strides = [1, 1]} : vector<8x256xf32> to vector<8x1xf32>
    %24 = vector.extract_strided_slice %13 {offsets = [0, 129], sizes = [8, 1], strides = [1, 1]} : vector<8x256xf32> to vector<8x1xf32>
    %25 = math.exp %24 : vector<8x1xf32>
    %cst_13 = arith.constant 9.99999974E-5 : f32
    %26 = vector.broadcast %cst_13 : f32 to vector<8x1xf32>
    %27 = arith.addf %25, %26 : vector<8x1xf32>
    %28 = math.sqrt %27 : vector<8x1xf32>
    %c0_14 = arith.constant 0 : index
    %c0_15 = arith.constant 0 : index
    %29 = vector.load %arg6[%c0_14, %c0_15] : memref<8x1xf32, #tpu.memory_space<vmem>>, vector<8x1xf32>
    %30 = arith.mulf %28, %29 : vector<8x1xf32>
    %31 = arith.addf %23, %30 : vector<8x1xf32>
    %32 = vector.broadcast %22 : vector<8x1xf32> to vector<8x128xf32>
    %33 = arith.mulf %19, %32 : vector<8x128xf32>
    %34 = arith.truncf %33 : vector<8x128xf32> to vector<8x128xbf16>
    %c0_16 = arith.constant 0 : index
    %c0_17 = arith.constant 0 : index
    %35 = vector.load %arg7[%c0_16, %c0_17] : memref<8x128xbf16, #tpu.memory_space<vmem>>, vector<8x128xbf16>
    tpu.vector_store %arg7[%c0_16, %c0_17], %34 {strides = array<i32>} : memref<8x128xbf16, #tpu.memory_space<vmem>>, vector<8x128xbf16>,
    %36 = math.exp %31 : vector<8x1xf32>
    %37 = arith.mulf %22, %36 : vector<8x1xf32>
    %38 = vector.broadcast %37 : vector<8x1xf32> to vector<8x128xf32>
    %39 = arith.mulf %19, %38 : vector<8x128xf32>
    %40 = arith.truncf %39 : vector<8x128xf32> to vector<8x128xbf16>
    %c0_18 = arith.constant 0 : index
    %c0_19 = arith.constant 0 : index
    %41 = vector.load %arg8[%c0_18, %c0_19] : memref<8x128xbf16, #tpu.memory_space<vmem>>, vector<8x128xbf16>
    tpu.vector_store %arg8[%c0_18, %c0_19], %40 {strides = array<i32>} : memref<8x128xbf16, #tpu.memory_space<vmem>>, vector<8x128xbf16>,
    %42 = tpu.iota {dimensions = array<i32: 1>} : vector<8x128xi32>
    %c0_i32 = arith.constant 0 : i32
    %43 = vector.broadcast %c0_i32 : i32 to vector<8x128xi32>
    %44 = arith.cmpi eq, %42, %43 : vector<8x128xi32>
    %c1_i32 = arith.constant 1 : i32
    %45 = vector.broadcast %c1_i32 : i32 to vector<8x128xi32>
    %46 = arith.cmpi eq, %42, %45 : vector<8x128xi32>
    %c2_i32 = arith.constant 2 : i32
    %47 = vector.broadcast %c2_i32 : i32 to vector<8x128xi32>
    %48 = arith.cmpi eq, %42, %47 : vector<8x128xi32>
    %cst_20 = arith.constant 0.000000e+00 : f32
    %49 = vector.shape_cast %31 : vector<8x1xf32> to vector<8x1xf32>
    %50 = vector.broadcast %49 : vector<8x1xf32> to vector<8x128xf32>
    %51 = vector.broadcast %cst_20 : f32 to vector<8x128xf32>
    %52 = arith.select %48, %50, %51 : vector<8x128xi1>, vector<8x128xf32>
    %53 = vector.shape_cast %27 : vector<8x1xf32> to vector<8x1xf32>
    %54 = vector.broadcast %53 : vector<8x1xf32> to vector<8x128xf32>
    %55 = arith.select %46, %54, %52 : vector<8x128xi1>, vector<8x128xf32>
    %56 = vector.shape_cast %23 : vector<8x1xf32> to vector<8x1xf32>
    %57 = vector.broadcast %56 : vector<8x1xf32> to vector<8x128xf32>
    %58 = arith.select %44, %57, %55 : vector<8x128xi1>, vector<8x128xf32>
    %c0_21 = arith.constant 0 : index
    %c0_22 = arith.constant 0 : index
    %59 = vector.load %arg9[%c0_21, %c0_22] : memref<8x128xf32, #tpu.memory_space<vmem>>, vector<8x128xf32>
    tpu.vector_store %arg9[%c0_21, %c0_22], %58 {strides = array<i32>} : memref<8x128xf32, #tpu.memory_space<vmem>>, vector<8x128xf32>,
    return
  }
  func.func @transform_0(%arg0: i32) -> (i32, i32) {
    %c0_i32 = arith.constant 0 : i32
    %c0_i32_0 = arith.constant 0 : i32
    return %arg0, %c0_i32 : i32, i32
  }
  func.func @transform_1(%arg0: i32) -> (i32, i32) {
    %c0_i32 = arith.constant 0 : i32
    %c0_i32_0 = arith.constant 0 : i32
    %c0_i32_1 = arith.constant 0 : i32
    return %c0_i32, %c0_i32_0 : i32, i32
  }
  func.func @transform_2(%arg0: i32) -> (i32, i32) {
    %c0_i32 = arith.constant 0 : i32
    %c0_i32_0 = arith.constant 0 : i32
    %c0_i32_1 = arith.constant 0 : i32
    return %c0_i32, %c0_i32_0 : i32, i32
  }
  func.func @transform_3(%arg0: i32) -> (i32, i32) {
    %c0_i32 = arith.constant 0 : i32
    %c0_i32_0 = arith.constant 0 : i32
    %c0_i32_1 = arith.constant 0 : i32
    return %c0_i32, %c0_i32_0 : i32, i32
  }
  func.func @transform_4(%arg0: i32) -> (i32, i32) {
    %c0_i32 = arith.constant 0 : i32
    %c0_i32_0 = arith.constant 0 : i32
    %c0_i32_1 = arith.constant 0 : i32
    return %c0_i32, %c0_i32_0 : i32, i32
  }
  func.func @transform_5(%arg0: i32) -> (i32, i32) {
    %c0_i32 = arith.constant 0 : i32
    %c0_i32_0 = arith.constant 0 : i32
    return %arg0, %c0_i32 : i32, i32
  }
  func.func @transform_6(%arg0: i32) -> (i32, i32) {
    %c0_i32 = arith.constant 0 : i32
    %c0_i32_0 = arith.constant 0 : i32
    return %arg0, %c0_i32 : i32, i32
  }
  func.func @transform_7(%arg0: i32) -> (i32, i32) {
    %c0_i32 = arith.constant 0 : i32
    %c0_i32_0 = arith.constant 0 : i32
    return %arg0, %c0_i32 : i32, i32
  }
  func.func @transform_8(%arg0: i32) -> (i32, i32) {
    %c0_i32 = arith.constant 0 : i32
    %c0_i32_0 = arith.constant 0 : i32
    return %arg0, %c0_i32 : i32, i32
  }
}

module attributes {stable_mosaic.version = 11 : i64} {
  func.func @poisson_decoder_kernel(%arg0: i32, %arg1: memref<8x32xbf16, #tpu.memory_space<vmem>>, %arg2: memref<32x128xbf16, #tpu.memory_space<vmem>>, %arg3: memref<1x128xf32, #tpu.memory_space<vmem>>, %arg4: memref<128x256xbf16, #tpu.memory_space<vmem>>, %arg5: memref<1x256xf32, #tpu.memory_space<vmem>>, %arg6: memref<8x1xf32, #tpu.memory_space<vmem>>, %arg7: memref<8x128xbf16, #tpu.memory_space<vmem>>, %arg8: memref<8x128xbf16, #tpu.memory_space<vmem>>, %arg9: memref<8x128xf32, #tpu.memory_space<vmem>>) attributes {dimension_semantics = [#tpu.dimension_semantics<parallel>], iteration_bounds = array<i64: 1>, scalar_prefetch = 0 : i64, scratch_operands = 0 : i64, tpu.core_type = #tpu.core_type<tc>, window_params = [{transform_indices = @transform_0, window_bounds = array<i64: 8, 32>}, {pipeline_mode = #tpu.pipeline_mode<synchronous>, transform_indices = @transform_1, window_bounds = array<i64: 32, 128>}, {pipeline_mode = #tpu.pipeline_mode<synchronous>, transform_indices = @transform_2, window_bounds = array<i64: 1, 128>}, {pipeline_mode = #tpu.pipeline_mode<synchronous>, transform_indices = @transform_3, window_bounds = array<i64: 128, 256>}, {pipeline_mode = #tpu.pipeline_mode<synchronous>, transform_indices = @transform_4, window_bounds = array<i64: 1, 256>}, {transform_indices = @transform_5, window_bounds = array<i64: 8, 1>}, {transform_indices = @transform_6, window_bounds = array<i64: 8, 128>}, {transform_indices = @transform_7, window_bounds = array<i64: 8, 128>}, {transform_indices = @transform_8, window_bounds = array<i64: 8, 128>}]} {
    %c0 = arith.constant 0 : index
    %c0_0 = arith.constant 0 : index
    %0 = vector.load %arg1[%c0, %c0_0] : memref<8x32xbf16, #tpu.memory_space<vmem>>, vector<8x32xbf16>
    %c0_1 = arith.constant 0 : index
    %c0_2 = arith.constant 0 : index
    %1 = vector.load %arg2[%c0_1, %c0_2] : memref<32x128xbf16, #tpu.memory_space<vmem>>, vector<32x128xbf16>
    %cst = arith.constant dense<0.000000e+00> : vector<8x128xf32>
    %2 = tpu.matmul %0, %1, %cst {dimension_numbers = #tpu.dot_dimension_numbers<[1], [0], [0], [1], [0, 0, 1, 1], [], []>} : vector<8x32xbf16>, vector<32x128xbf16>, vector<8x128xf32> -> vector<8x128xf32>
    %c0_3 = arith.constant 0 : index
    %c0_4 = arith.constant 0 : index
    %3 = vector.load %arg3[%c0_3, %c0_4] : memref<1x128xf32, #tpu.memory_space<vmem>>, vector<1x128xf32>
    %4 = vector.broadcast %3 : vector<1x128xf32> to vector<8x128xf32>
    %5 = arith.addf %2, %4 : vector<8x128xf32>
    %cst_5 = arith.constant 0.000000e+00 : f32
    %6 = vector.broadcast %cst_5 : f32 to vector<8x128xf32>
    %7 = arith.maximumf %5, %6 : vector<8x128xf32>
    %8 = arith.truncf %7 : vector<8x128xf32> to vector<8x128xbf16>
    %c0_6 = arith.constant 0 : index
    %c0_7 = arith.constant 0 : index
    %9 = vector.load %arg4[%c0_6, %c0_7] : memref<128x256xbf16, #tpu.memory_space<vmem>>, vector<128x256xbf16>
    %cst_8 = arith.constant dense<0.000000e+00> : vector<8x256xf32>
    %10 = tpu.matmul %8, %9, %cst_8 {dimension_numbers = #tpu.dot_dimension_numbers<[1], [0], [0], [1], [0, 0, 1, 1], [], []>} : vector<8x128xbf16>, vector<128x256xbf16>, vector<8x256xf32> -> vector<8x256xf32>
    %c0_9 = arith.constant 0 : index
    %c0_10 = arith.constant 0 : index
    %11 = vector.load %arg5[%c0_9, %c0_10] : memref<1x256xf32, #tpu.memory_space<vmem>>, vector<1x256xf32>
    %12 = vector.broadcast %11 : vector<1x256xf32> to vector<8x256xf32>
    %13 = arith.addf %10, %12 : vector<8x256xf32>
    %14 = vector.extract_strided_slice %13 {offsets = [0, 0], sizes = [8, 128], strides = [1, 1]} : vector<8x256xf32> to vector<8x128xf32>
    %cst_11 = arith.constant dense<0xFF800000> : vector<8xf32>
    %15 = vector.multi_reduction <maximumf>, %14, %cst_11 [1] : vector<8x128xf32> to vector<8xf32>
    %16 = vector.shape_cast %15 : vector<8xf32> to vector<8x1xf32>
    %17 = vector.broadcast %16 : vector<8x1xf32> to vector<8x128xf32>
    %18 = arith.subf %14, %17 : vector<8x128xf32>
    %19 = math.exp %18 : vector<8x128xf32>
    %cst_12 = arith.constant dense<0.000000e+00> : vector<8xf32>
    %20 = vector.multi_reduction <add>, %19, %cst_12 [1] : vector<8x128xf32> to vector<8xf32>
    %21 = vector.shape_cast %20 : vector<8xf32> to vector<8x1xf32>
    %22 = tpu.reciprocal %21 {approx = true} : vector<8x1xf32> -> vector<8x1xf32>
    %23 = vector.extract_strided_slice %13 {offsets = [0, 128], sizes = [8, 1], strides = [1, 1]} : vector<8x256xf32> to vector<8x1xf32>
    %24 = vector.extract_strided_slice %13 {offsets = [0, 129], sizes = [8, 1], strides = [1, 1]} : vector<8x256xf32> to vector<8x1xf32>
    %25 = math.exp %24 : vector<8x1xf32>
    %cst_13 = arith.constant 9.99999974E-5 : f32
    %26 = vector.broadcast %cst_13 : f32 to vector<8x1xf32>
    %27 = arith.addf %25, %26 : vector<8x1xf32>
    %28 = math.sqrt %27 : vector<8x1xf32>
    %c0_14 = arith.constant 0 : index
    %c0_15 = arith.constant 0 : index
    %29 = vector.load %arg6[%c0_14, %c0_15] : memref<8x1xf32, #tpu.memory_space<vmem>>, vector<8x1xf32>
    %30 = arith.mulf %28, %29 : vector<8x1xf32>
    %31 = arith.addf %23, %30 : vector<8x1xf32>
    %32 = vector.broadcast %22 : vector<8x1xf32> to vector<8x128xf32>
    %33 = arith.mulf %19, %32 : vector<8x128xf32>
    %34 = arith.truncf %33 : vector<8x128xf32> to vector<8x128xbf16>
    %c0_16 = arith.constant 0 : index
    %c0_17 = arith.constant 0 : index
    %35 = vector.load %arg7[%c0_16, %c0_17] : memref<8x128xbf16, #tpu.memory_space<vmem>>, vector<8x128xbf16>
    tpu.vector_store %arg7[%c0_16, %c0_17], %34 {strides = array<i32>} : memref<8x128xbf16, #tpu.memory_space<vmem>>, vector<8x128xbf16>,
    %36 = math.exp %31 : vector<8x1xf32>
    %37 = arith.mulf %22, %36 : vector<8x1xf32>
    %38 = vector.broadcast %37 : vector<8x1xf32> to vector<8x128xf32>
    %39 = arith.mulf %19, %38 : vector<8x128xf32>
    %40 = arith.truncf %39 : vector<8x128xf32> to vector<8x128xbf16>
    %c0_18 = arith.constant 0 : index
    %c0_19 = arith.constant 0 : index
    %41 = vector.load %arg8[%c0_18, %c0_19] : memref<8x128xbf16, #tpu.memory_space<vmem>>, vector<8x128xbf16>
    tpu.vector_store %arg8[%c0_18, %c0_19], %40 {strides = array<i32>} : memref<8x128xbf16, #tpu.memory_space<vmem>>, vector<8x128xbf16>,
    %42 = tpu.iota {dimensions = array<i32: 1>} : vector<8x128xi32>
    %c0_i32 = arith.constant 0 : i32
    %43 = vector.broadcast %c0_i32 : i32 to vector<8x128xi32>
    %44 = arith.cmpi eq, %42, %43 : vector<8x128xi32>
    %c1_i32 = arith.constant 1 : i32
    %45 = vector.broadcast %c1_i32 : i32 to vector<8x128xi32>
    %46 = arith.cmpi eq, %42, %45 : vector<8x128xi32>
    %c2_i32 = arith.constant 2 : i32
    %47 = vector.broadcast %c2_i32 : i32 to vector<8x128xi32>
    %48 = arith.cmpi eq, %42, %47 : vector<8x128xi32>
    %cst_20 = arith.constant 0.000000e+00 : f32
    %49 = vector.shape_cast %31 : vector<8x1xf32> to vector<8x1xf32>
    %50 = vector.broadcast %49 : vector<8x1xf32> to vector<8x128xf32>
    %51 = vector.broadcast %cst_20 : f32 to vector<8x128xf32>
    %52 = arith.select %48, %50, %51 : vector<8x128xi1>, vector<8x128xf32>
    %53 = vector.shape_cast %27 : vector<8x1xf32> to vector<8x1xf32>
    %54 = vector.broadcast %53 : vector<8x1xf32> to vector<8x128xf32>
    %55 = arith.select %46, %54, %52 : vector<8x128xi1>, vector<8x128xf32>
    %56 = vector.shape_cast %23 : vector<8x1xf32> to vector<8x1xf32>
    %57 = vector.broadcast %56 : vector<8x1xf32> to vector<8x128xf32>
    %58 = arith.select %44, %57, %55 : vector<8x128xi1>, vector<8x128xf32>
    %c0_21 = arith.constant 0 : index
    %c0_22 = arith.constant 0 : index
    %59 = vector.load %arg9[%c0_21, %c0_22] : memref<8x128xf32, #tpu.memory_space<vmem>>, vector<8x128xf32>
    tpu.vector_store %arg9[%c0_21, %c0_22], %58 {strides = array<i32>} : memref<8x128xf32, #tpu.memory_space<vmem>>, vector<8x128xf32>,
    return
  }
  func.func @transform_0(%arg0: i32) -> (i32, i32) {
    %c0_i32 = arith.constant 0 : i32
    %c0_i32_0 = arith.constant 0 : i32
    return %arg0, %c0_i32 : i32, i32
  }
  func.func @transform_1(%arg0: i32) -> (i32, i32) {
    %c0_i32 = arith.constant 0 : i32
    %c0_i32_0 = arith.constant 0 : i32
    %c0_i32_1 = arith.constant 0 : i32
    return %c0_i32, %c0_i32_0 : i32, i32
  }
  func.func @transform_2(%arg0: i32) -> (i32, i32) {
    %c0_i32 = arith.constant 0 : i32
    %c0_i32_0 = arith.constant 0 : i32
    %c0_i32_1 = arith.constant 0 : i32
    return %c0_i32, %c0_i32_0 : i32, i32
  }
  func.func @transform_3(%arg0: i32) -> (i32, i32) {
    %c0_i32 = arith.constant 0 : i32
    %c0_i32_0 = arith.constant 0 : i32
    %c0_i32_1 = arith.constant 0 : i32
    return %c0_i32, %c0_i32_0 : i32, i32
  }
  func.func @transform_4(%arg0: i32) -> (i32, i32) {
    %c0_i32 = arith.constant 0 : i32
    %c0_i32_0 = arith.constant 0 : i32
    %c0_i32_1 = arith.constant 0 : i32
    return %c0_i32, %c0_i32_0 : i32, i32
  }
  func.func @transform_5(%arg0: i32) -> (i32, i32) {
    %c0_i32 = arith.constant 0 : i32
    %c0_i32_0 = arith.constant 0 : i32
    return %arg0, %c0_i32 : i32, i32
  }
  func.func @transform_6(%arg0: i32) -> (i32, i32) {
    %c0_i32 = arith.constant 0 : i32
    %c0_i32_0 = arith.constant 0 : i32
    return %arg0, %c0_i32 : i32, i32
  }
  func.func @transform_7(%arg0: i32) -> (i32, i32) {
    %c0_i32 = arith.constant 0 : i32
    %c0_i32_0 = arith.constant 0 : i32
    return %arg0, %c0_i32 : i32, i32
  }
  func.func @transform_8(%arg0: i32) -> (i32, i32) {
    %c0_i32 = arith.constant 0 : i32
    %c0_i32_0 = arith.constant 0 : i32
    return %arg0, %c0_i32 : i32, i32
  }
}

</mosaic_0001>

<bundles_post_ra>
// kernel: tpu_custom_call.1
= control target key start
LH: loop header
LB: loop body
LE: loop exit
PB: predicated region body
PF: predicated region fallthrough
CT: control target
= control target key end

     0   :  { %14 = vsyncpa [#allocation3], 0  ;;  %s668_s0 = inlined_call_operand.vmem [shape: bf16[8,32], index: 0, kind: input, shape index: {}]   ;;  %s669_s1 = inlined_call_operand.hbm [shape: bf16[32,128], index: 1, kind: input, shape index: {}]   ;;  %s670_s2 = inlined_call_operand.vmem [shape: f32[1,128], index: 2, kind: input, shape index: {}]   ;;  %s671_s3 = inlined_call_operand.hbm [shape: bf16[128,256], index: 3, kind: input, shape index: {}]   ;;  %s672_s4 = inlined_call_operand.vmem [shape: f32[1,256], index: 4, kind: input, shape index: {}]   ;;  %s673_s5 = inlined_call_operand.vmem [shape: f32[8,1], index: 5, kind: input, shape index: {}]   ;;  %s674_s6 = inlined_call_operand.hbm [shape: bf16[8,128], index: 6, kind: output, shape index: {0}]   ;;  %s675_s7 = inlined_call_operand.hbm [shape: bf16[8,128], index: 7, kind: output, shape index: {1}]   ;;  %s676_s8 = inlined_call_operand.hbm [shape: f32[8,128], index: 8, kind: output, shape index: {2}]  }
   0x1   :  { %15 = vsyncpa [#allocation6], 0 }
   0x2   :  { %16 = vsyncpa [#allocation4], 0 }
   0x3   :  { %17 = vsyncpa [#allocation9], 0  ;;  %s579_s27 = smov [#allocation2]  }
   0x4   :  { %s25_s28 = sshll.u32 %s579_s27, 4  ;;  %s26_s28 = int_to_ptr.vmem [resolvable:$true] %s25_s28 }
   0x5   :  { %s479_s29 = scalar_lea.vmem %s26_s28, 256  ;;  %p484_p1 = scmp.lt.s32.totalorder %s26_s28, %s26_s28 }
   0x6   :  { %p480_p0 = scmp.ne.s32.totalorder %s26_s28, %s479_s29  ;;  %p485_p2 = scmp.lt.s32.totalorder %s479_s29, %s479_s29 }
   0x8   :  { %p486_p3 = por %p485_p2, %p484_p1 }
   0xa   :  { %p487_p4 = pnand %p486_p3, %p480_p0 }
   0xc   :  { %490 = shalt.err (!%p487_p4)
}
   0xd   :  { %s580_s30 = smov 64   ;;  %s581_s9 = smov 4  }
   0xe   :  { %31 = dma.hbm_to_vmem [thread:$0]  %s669_s1, 256, %s26_s28, [#allocation3], %s580_s30, %s580_s30, %s581_s9  }
   0xf   :  { %s582_s12 = smov [#allocation5]  }
  0x10   :  { %s39_s13 = sshll.u32 %s582_s12, 4  ;;  %s40_s13 = int_to_ptr.vmem [resolvable:$true] %s39_s13 }
  0x11   :  { %s499_s14 = scalar_lea.vmem %s40_s13, 2048  ;;  %p504_p6 = scmp.lt.s32.totalorder %s40_s13, %s40_s13 }
  0x12   :  { %p500_p5 = scmp.ne.s32.totalorder %s40_s13, %s499_s14  ;;  %p505_p7 = scmp.lt.s32.totalorder %s499_s14, %s499_s14 }
  0x14   :  { %p506_p8 = por %p505_p7, %p504_p6 }
  0x16   :  { %p507_p9 = pnand %p506_p8, %p500_p5 }
  0x18   :  { %510 = shalt.err (!%p507_p9)
}
  0x19   :  { %s583_s15 = smov 128   ;;  %s584_s16 = smov 8  }
  0x1a   :  { %45 = dma.hbm_to_vmem [thread:$0]  %s671_s3, 2048, %s40_s13, [#allocation6], %s583_s15, %s583_s15, %s584_s16  }
  0x1b   :  { %571 = dma.done.wait [#allocation3], 256  }
  0x1c   :  { %572 = vsyncadd [#allocation3], 4294967040 }
  0x1d   :  { %573 = dma.done.wait [#allocation6], 2048  }
  0x1e   :  { %574 = vsyncadd [#allocation6], 4294965248  ;;  %v585_v0 = vmov 0.0   ;;  %vm586_vm0 = vmmov 0   ;;  %v435_v1 = vld [vmem:[#allocation2 + $0x8] sm:$0xff]   ;;  %v436_v2 = vld [vmem:[#allocation2] sm:$0xff]   ;;  %v145_v30 = vlaneseq }
  0x1f   :  { %409 = vmatprep.subr.bf16.mxu0 %v585_v0  ;;  %413 = vmatprep.mubr.msk.bf16.mxu0 %vm586_vm0, %v585_v0  ;;  %v437_v3 = vld [vmem:[#allocation5 + $0x74] ss:$8 sps:$4 sm:$0xff]   ;;  %v439_v4 = vld [vmem:[#allocation5 + $0x70] ss:$8 sps:$4 sm:$0xff]   ;;  %v440_v5 = vld [vmem:[#allocation5 + $0x64] ss:$8 sps:$4 sm:$0xff]  }
  0x20   :  { %410 = vmatpush3.bf16.msra.mxu0 %v435_v1  ;;  %v57_v6 = vld [vmem:[%s668_s0] sm:$0xf]  ;;  %235 = vmatprep.subr.bf16.mxu1 %v437_v3  ;;  %vm81_vm1 = vcmask 261120   ;;  %v442_v7 = vld [vmem:[#allocation5 + $0x60] ss:$8 sps:$4 sm:$0xff]   ;;  %v587_v20 = vmov 0  }
  0x21   :  { %411 = vmatprep.subr.bf16.mxu0 %v585_v0  ;;  %236 = vmatpush1.bf16.msra.mxu1 %v439_v4  ;;  %v443_v8 = vld [vmem:[#allocation5 + $0x54] ss:$8 sps:$4 sm:$0xff]   ;;  %v445_v9 = vld [vmem:[#allocation5 + $0x50] ss:$8 sps:$4 sm:$0xff]   ;;  %v446_v10 = vld [vmem:[#allocation5 + $0x44] ss:$8 sps:$4 sm:$0xff]  }
  0x22   :  { %237 = vmatprep.subr.bf16.mxu1 %v440_v5  ;;  %v448_v11 = vld [vmem:[#allocation5 + $0x40] ss:$8 sps:$4 sm:$0xff]   ;;  %v449_v12 = vld [vmem:[#allocation5 + $0x34] ss:$8 sps:$4 sm:$0xff]   ;;  %v451_v13 = vld [vmem:[#allocation5 + $0x30] ss:$8 sps:$4 sm:$0xff]   ;;  %267 = vmatprep.mubr.bf16.mxu1 %v587_v20 }
  0x23   :  { %v452_v14 = vld [vmem:[#allocation5 + $0x24] ss:$8 sps:$4 sm:$0xff]   ;;  %v454_v15 = vld [vmem:[#allocation5 + $0x20] ss:$8 sps:$4 sm:$0xff]   ;;  %v455_v16 = vld [vmem:[#allocation5 + $0x14] ss:$8 sps:$4 sm:$0xff]   ;;  %432 = vset.pattern.permute.xlu1 %v587_v20 }
  0x24   :  { %412 = vmatpush3.bf16.msra.mxu0 %v436_v2  ;;  %v457_v17 = vld [vmem:[#allocation5 + $0x10] ss:$8 sps:$4 sm:$0xff]   ;;  %v458_v18 = vld [vmem:[#allocation5 + $0x4] ss:$8 sps:$4 sm:$0xff]   ;;  %v460_v19 = vld [vmem:[#allocation5] ss:$8 sps:$4 sm:$0xff]  }
  0x25   :  { %238 = vmatpush1.bf16.msra.mxu1 %v442_v7  ;;  %v386_v21 = vld [vmem:[%s670_s2] ss:$0 sm:$0xff]  ;;  %v588_v29 = vmov 1   ;;  %v146_v31 = vshrl.u32 %v145_v30, 7  ;;  %s589_s23 = smov 1  }
  0x26   :  { %239 = vmatprep.subr.bf16.mxu1 %v443_v8  ;;  %433 = vset.pattern.permute.xlu0 %v588_v29  ;;  %v143_v33 = vld [vmem:[%s672_s4] sm:$0x3]  ;;  %s590_s4 = smov 127  }
  0x27   :  { %414 = vmatmul.mubr.msk.bf16.vlgmr.msra.gmra.mxu0 %vm81_vm1, %v57_v6  ;;  %v147_v32 = vsub.s32 0, %v146_v31  ;;  %v151_v34 = vsub.s32 1, %v146_v31  ;;  %v294_v44 = vld [vmem:[%s673_s5] sm:$0xff]  ;;  %s591_s5 = smov [#allocation7]  }
  0x28   :  { %s349_s24 = sshll.u32 %s591_s5, 4  ;;  %s350_s24 = int_to_ptr.vmem [resolvable:$true] %s349_s24 }
  0x29   :  { %240 = vmatpush1.bf16.msra.mxu1 %v445_v9  ;;  %v148_v35 = vrot.slane %v143_v33, %v147_v32  ;;  %v152_v36 = vrot.slane %v143_v33, %v151_v34  ;;  %s511_s25 = scalar_lea.vmem %s350_s24, 64  ;;  %p516_p11 = scmp.lt.s32.totalorder %s350_s24, %s350_s24 }
  0x2a   :  { %241 = vmatprep.subr.bf16.mxu1 %v446_v10  ;;  %p512_p10 = scmp.ne.s32.totalorder %s350_s24, %s511_s25  ;;  %p517_p12 = scmp.lt.s32.totalorder %s511_s25, %s511_s25 }
  0x2c   :  { %p518_p13 = por %p517_p12, %p516_p11 }
  0x2d   :  { %242 = vmatpush1.bf16.msra.mxu1 %v448_v11 }
  0x2e   :  { %243 = vmatprep.subr.bf16.mxu1 %v449_v12  ;;  %p519_p0 = pnand %p518_p13, %p512_p10 }
  0x31   :  { %244 = vmatpush1.bf16.msra.mxu1 %v451_v13 }
  0x32   :  { %245 = vmatprep.subr.bf16.mxu1 %v452_v14 }
  0x35   :  { %246 = vmatpush1.bf16.msra.mxu1 %v454_v15 }
  0x36   :  { %247 = vmatprep.subr.bf16.mxu1 %v455_v16 }
  0x39   :  { %248 = vmatpush1.bf16.msra.mxu1 %v457_v17 }
  0x3a   :  { %249 = vmatprep.subr.bf16.mxu1 %v458_v18 }
  0x3d   :  { %250 = vmatpush1.bf16.msra.mxu1 %v460_v19 }
  0xe7   :  { %v119_v22 = vpop.f32.mrf.mxu0 }
  0xe8   :  { %v120_v23 = vadd.f32 %v386_v21, %v119_v22 }
  0xe9   :  { %v415_v24 = vpop.f32.mrf.mxu0 }
  0xea   :  { %v125_v25 = vmax.f32 %v120_v23, 0.0 }
  0xeb   :  { %v122_v26 = vpop.f32.mrf.mxu0 }
  0xec   :  { %v126_v27 = vpack.c.bf16 %v125_v25, %v125_v25 }
  0xed   :  { %v416_v28 = vpop.f32.mrf.mxu0 }
  0xee   :  { %268 = vmatmul.mubr.bf16.vlgmr.msra.gmra.mxu1 %v126_v27 }
 0x1ae   :  { %v269_v37 = vpop.f32.mrf.mxu1 }
 0x1af   :  { %v270_v38 = vadd.f32 %v269_v37, %v148_v35 }
 0x1b0   :  { %v271_v39 = vpop.f32.mrf.mxu1 }
 0x1b1   :  { %v272_v40 = vadd.f32 %v271_v39, %v152_v36  ;;  %276 = vmax.xlane.f32.xlu0 %v270_v38 }
 0x1b2   :  { %v273_v41 = vpop.f32.mrf.mxu1 }
 0x1b3   :  { %v284_v43 = vmul.f32 1.442695, %v272_v40 }
 0x1b4   :  { %v274_v42 = vpop.f32.mrf.mxu1 }
 0x1b5   :  { %461 = vpow2.f32 %v284_v43 }
 0x1c2   :  { %v462_v45 = vpop.eup %461 }
 0x1c3   :  { %v286_v46 = vadd.f32 0.0001, %v462_v45 }
 0x1c5   :  { %vm289_vm2 = vcmp.eq.f32.partialorder %v286_v46, inf  ;;  %v292_v54 = vand.u32 2147483648, %v286_v46  ;;  %vm291_vm3 = vcmp.eq.f32.partialorder %v286_v46, 0.0 }
 0x1c7   :  { %296 = vrot.lane.b32.xlu0 %v294_v44, %s589_s23 }
 0x1cb   :  { %332 = vperm.xlu0 %433, %v286_v46  }
 0x1cf   :  { %434 = vset.pattern.permute.xlu0 %v587_v20 }
 0x23a   :  { %v277_v47 = vpop.xlane.xlu0 %276 }
 0x23b   :  { %v278_v48 = vsub.f32 %v270_v38, %v277_v47 }
 0x23d   :  { %v279_v49 = vmul.f32 1.442695, %v278_v48 }
 0x23e   :  { %v297_v55 = vpop.permute.xlu0 %296 }
 0x23f   :  { %463 = vpow2.f32 %v279_v49 }
 0x240   :  { %465 = vrsqrt.f32 %v286_v46 }
 0x24c   :  { %v464_v50 = vpop.eup %463 }
 0x24d   :  { %281 = vadd.xlane.f32.xlu1 %v464_v50  ;;  %v466_v51 = vpop.eup %465 }
 0x24e   :  { %v288_v52 = vmul.f32 %v466_v51, %v286_v46 }
 0x250   :  { %v290_v53 = vsel %vm289_vm2, %v286_v46, %v288_v52 }
 0x251   :  { %v293_v56 = vsel %vm291_vm3, %v292_v54, %v290_v53 }
 0x252   :  { %v299_v57 = vmul.f32 %v297_v55, %v293_v56 }
 0x25e   :  { %301 = vrot.lane.b32.xlu1 %v299_v57, %s590_s4 }
 0x2d6   :  { %v282_v58 = vpop.xlane.xlu1 %281 }
 0x2d7   :  { %467 = vrcp.f32 %v282_v58 }
 0x2da   :  { %v302_v59 = vpop.permute.xlu1 %301 }
 0x2db   :  { %v304_v60 = vadd.f32 %v302_v59, %v272_v40 }
 0x2dd   :  { %v308_v61 = vmul.f32 1.442695, %v304_v60  ;;  %326 = vperm.xlu1 %432, %v304_v60  }
 0x2df   :  { %469 = vpow2.f32 %v308_v61 }
 0x2e4   :  { %v468_v62 = vpop.eup %467 }
 0x2e5   :  { %v305_v63 = vmul.f32 %v468_v62, %v464_v50 }
 0x2e7   :  { %v306_v0 = vpack.c.bf16 %v305_v63, %v305_v63 }
 0x2e9   :  { %307 = vst [vmem:[#allocation7] sm:$0xf] %v306_v0 }
 0x2ec   :  { %v470_v1 = vpop.eup %469 }
 0x2ed   :  { %v310_v2 = vmul.f32 %v470_v1, %v468_v62 }
 0x2ef   :  { %313 = vperm.xlu1 %432, %v310_v2  }
 0x2f0   :  { %522 = shalt.err (!%p519_p0)
}
 0x2f1   :  { %352 = dma.vmem_to_hbm [thread:$0]  %s350_s24, 64, %s674_s6, [#allocation4]   ;;  %v320_v3 = vand.u32 127, %v145_v30  ;;  %v333_v8 = vpop.permute.xlu0 %332 }
 0x2f2   :  { %s592_s28 = smov [#allocation8]   ;;  %s593_s30 = smov [#allocation10]  }
 0x2f3   :  { %338 = vperm.xlu1 %432, %v272_v40   ;;  %vm323_vm4 = vcmp.eq.s32.totalorder %v320_v3, 2  ;;  %s359_s29 = sshll.u32 %s592_s28, 4  ;;  %vm322_vm5 = vcmp.eq.s32.totalorder %v320_v3, 1  ;;  %s369_s9 = sshll.u32 %s593_s30, 4  ;;  %vm321_vm6 = vcmp.eq.s32.totalorder %v320_v3, 0  ;;  %s360_s29 = int_to_ptr.vmem [resolvable:$true] %s359_s29  ;;  %s370_s9 = int_to_ptr.vmem [resolvable:$true] %s369_s9 }
 0x2f4   :  { %s531_s6 = scalar_lea.vmem %s360_s29, 64  ;;  %p536_p2 = scmp.lt.s32.totalorder %s360_s29, %s360_s29 }
 0x2f5   :  { %p532_p1 = scmp.ne.s32.totalorder %s360_s29, %s531_s6  ;;  %p537_p3 = scmp.lt.s32.totalorder %s531_s6, %s531_s6 }
 0x2f7   :  { %p538_p4 = por %p537_p3, %p536_p2 }
 0x2f9   :  { %p539_p5 = pnand %p538_p4, %p532_p1 }
 0x358   :  { %v327_v4 = vpop.permute.xlu1 %326 }
 0x359   :  { %v329_v6 = vsel %vm323_vm4, %v327_v4, 0.0 }
 0x35a   :  { %v335_v10 = vsel %vm322_vm5, %v333_v8, %v329_v6 }
 0x36a   :  { %v314_v5 = vpop.permute.xlu1 %313 }
 0x36b   :  { %v316_v7 = vmul.f32 %v464_v50, %v314_v5 }
 0x36d   :  { %v317_v9 = vpack.c.bf16 %v316_v7, %v316_v7 }
 0x36e   :  { %v339_v11 = vpop.permute.xlu1 %338 }
 0x36f   :  { %318 = vst [vmem:[#allocation8] sm:$0xf] %v317_v9  ;;  %v341_v12 = vsel %vm321_vm6, %v339_v11, %v335_v10 }
 0x370   :  { %342 = vst [vmem:[#allocation10] sm:$0xff] %v341_v12 }
 0x371   :  { %542 = shalt.err (!%p539_p5)
}
 0x372   :  { %362 = dma.vmem_to_hbm [thread:$0]  %s360_s29, 64, %s675_s7, [#allocation9]  }
 0x373   :  { %s551_s12 = scalar_lea.vmem %s370_s9, 128  ;;  %p556_p7 = scmp.lt.s32.totalorder %s370_s9, %s370_s9 }
 0x374   :  { %p552_p6 = scmp.ne.s32.totalorder %s370_s9, %s551_s12  ;;  %p557_p8 = scmp.lt.s32.totalorder %s551_s12, %s551_s12 }
 0x376   :  { %p558_p9 = por %p557_p8, %p556_p7 }
 0x378   :  { %p559_p10 = pnand %p558_p9, %p552_p6 }
 0x37a   :  { %562 = shalt.err (!%p559_p10)
}
 0x37b   :  { %372 = dma.vmem_to_hbm [thread:$0]  %s370_s9, 128, %s676_s8, [#allocation9]  }
 0x37c   :  { %575 = dma.done.wait [#allocation4], 64  }
 0x37d   :  { %576 = vsyncadd [#allocation4], 4294967232 }
 0x37e   :  { %577 = dma.done.wait [#allocation9], 192  }
 0x37f   :  { %578 = vsyncadd [#allocation9], 4294967104 }
 0x380   :  { %382 = vsyncpa [#allocation3], 1 }
 0x381   :  { %383 = vsyncpa [#allocation6], 1 }
 0x382   :  { %384 = vsyncpa [#allocation4], 1 }
 0x383   :  { %385 = vsyncpa [#allocation9], 1 }

// kernel: tpu_custom_call.1
= control target key start
LH: loop header
LB: loop body
LE: loop exit
PB: predicated region body
PF: predicated region fallthrough
CT: control target
= control target key end

     0   :  { %14 = vsyncpa [#allocation3], 0  ;;  %s668_s0 = inlined_call_operand.vmem [shape: bf16[8,32], index: 0, kind: input, shape index: {}]   ;;  %s669_s1 = inlined_call_operand.hbm [shape: bf16[32,128], index: 1, kind: input, shape index: {}]   ;;  %s670_s2 = inlined_call_operand.vmem [shape: f32[1,128], index: 2, kind: input, shape index: {}]   ;;  %s671_s3 = inlined_call_operand.hbm [shape: bf16[128,256], index: 3, kind: input, shape index: {}]   ;;  %s672_s4 = inlined_call_operand.vmem [shape: f32[1,256], index: 4, kind: input, shape index: {}]   ;;  %s673_s5 = inlined_call_operand.vmem [shape: f32[8,1], index: 5, kind: input, shape index: {}]   ;;  %s674_s6 = inlined_call_operand.hbm [shape: bf16[8,128], index: 6, kind: output, shape index: {0}]   ;;  %s675_s7 = inlined_call_operand.hbm [shape: bf16[8,128], index: 7, kind: output, shape index: {1}]   ;;  %s676_s8 = inlined_call_operand.hbm [shape: f32[8,128], index: 8, kind: output, shape index: {2}]  }
   0x1   :  { %15 = vsyncpa [#allocation6], 0 }
   0x2   :  { %16 = vsyncpa [#allocation4], 0 }
   0x3   :  { %17 = vsyncpa [#allocation9], 0  ;;  %s579_s27 = smov [#allocation2]  }
   0x4   :  { %s25_s28 = sshll.u32 %s579_s27, 4  ;;  %s26_s28 = int_to_ptr.vmem [resolvable:$true] %s25_s28 }
   0x5   :  { %s479_s29 = scalar_lea.vmem %s26_s28, 256  ;;  %p484_p1 = scmp.lt.s32.totalorder %s26_s28, %s26_s28 }
   0x6   :  { %p480_p0 = scmp.ne.s32.totalorder %s26_s28, %s479_s29  ;;  %p485_p2 = scmp.lt.s32.totalorder %s479_s29, %s479_s29 }
   0x8   :  { %p486_p3 = por %p485_p2, %p484_p1 }
   0xa   :  { %p487_p4 = pnand %p486_p3, %p480_p0 }
   0xc   :  { %490 = shalt.err (!%p487_p4)
}
   0xd   :  { %s580_s30 = smov 64   ;;  %s581_s9 = smov 4  }
   0xe   :  { %31 = dma.hbm_to_vmem [thread:$0]  %s669_s1, 256, %s26_s28, [#allocation3], %s580_s30, %s580_s30, %s581_s9  }
   0xf   :  { %s582_s12 = smov [#allocation5]  }
  0x10   :  { %s39_s13 = sshll.u32 %s582_s12, 4  ;;  %s40_s13 = int_to_ptr.vmem [resolvable:$true] %s39_s13 }
  0x11   :  { %s499_s14 = scalar_lea.vmem %s40_s13, 2048  ;;  %p504_p6 = scmp.lt.s32.totalorder %s40_s13, %s40_s13 }
  0x12   :  { %p500_p5 = scmp.ne.s32.totalorder %s40_s13, %s499_s14  ;;  %p505_p7 = scmp.lt.s32.totalorder %s499_s14, %s499_s14 }
  0x14   :  { %p506_p8 = por %p505_p7, %p504_p6 }
  0x16   :  { %p507_p9 = pnand %p506_p8, %p500_p5 }
  0x18   :  { %510 = shalt.err (!%p507_p9)
}
  0x19   :  { %s583_s15 = smov 128   ;;  %s584_s16 = smov 8  }
  0x1a   :  { %45 = dma.hbm_to_vmem [thread:$0]  %s671_s3, 2048, %s40_s13, [#allocation6], %s583_s15, %s583_s15, %s584_s16  }
  0x1b   :  { %571 = dma.done.wait [#allocation3], 256  }
  0x1c   :  { %572 = vsyncadd [#allocation3], 4294967040 }
  0x1d   :  { %573 = dma.done.wait [#allocation6], 2048  }
  0x1e   :  { %574 = vsyncadd [#allocation6], 4294965248  ;;  %v585_v0 = vmov 0.0   ;;  %vm586_vm0 = vmmov 0   ;;  %v435_v1 = vld [vmem:[#allocation2 + $0x8] sm:$0xff]   ;;  %v436_v2 = vld [vmem:[#allocation2] sm:$0xff]   ;;  %v145_v30 = vlaneseq }
  0x1f   :  { %409 = vmatprep.subr.bf16.mxu0 %v585_v0  ;;  %413 = vmatprep.mubr.msk.bf16.mxu0 %vm586_vm0, %v585_v0  ;;  %v437_v3 = vld [vmem:[#allocation5 + $0x74] ss:$8 sps:$4 sm:$0xff]   ;;  %v439_v4 = vld [vmem:[#allocation5 + $0x70] ss:$8 sps:$4 sm:$0xff]   ;;  %v440_v5 = vld [vmem:[#allocation5 + $0x64] ss:$8 sps:$4 sm:$0xff]  }
  0x20   :  { %410 = vmatpush3.bf16.msra.mxu0 %v435_v1  ;;  %v57_v6 = vld [vmem:[%s668_s0] sm:$0xf]  ;;  %235 = vmatprep.subr.bf16.mxu1 %v437_v3  ;;  %vm81_vm1 = vcmask 261120   ;;  %v442_v7 = vld [vmem:[#allocation5 + $0x60] ss:$8 sps:$4 sm:$0xff]   ;;  %v587_v20 = vmov 0  }
  0x21   :  { %411 = vmatprep.subr.bf16.mxu0 %v585_v0  ;;  %236 = vmatpush1.bf16.msra.mxu1 %v439_v4  ;;  %v443_v8 = vld [vmem:[#allocation5 + $0x54] ss:$8 sps:$4 sm:$0xff]   ;;  %v445_v9 = vld [vmem:[#allocation5 + $0x50] ss:$8 sps:$4 sm:$0xff]   ;;  %v446_v10 = vld [vmem:[#allocation5 + $0x44] ss:$8 sps:$4 sm:$0xff]  }
  0x22   :  { %237 = vmatprep.subr.bf16.mxu1 %v440_v5  ;;  %v448_v11 = vld [vmem:[#allocation5 + $0x40] ss:$8 sps:$4 sm:$0xff]   ;;  %v449_v12 = vld [vmem:[#allocation5 + $0x34] ss:$8 sps:$4 sm:$0xff]   ;;  %v451_v13 = vld [vmem:[#allocation5 + $0x30] ss:$8 sps:$4 sm:$0xff]   ;;  %267 = vmatprep.mubr.bf16.mxu1 %v587_v20 }
  0x23   :  { %v452_v14 = vld [vmem:[#allocation5 + $0x24] ss:$8 sps:$4 sm:$0xff]   ;;  %v454_v15 = vld [vmem:[#allocation5 + $0x20] ss:$8 sps:$4 sm:$0xff]   ;;  %v455_v16 = vld [vmem:[#allocation5 + $0x14] ss:$8 sps:$4 sm:$0xff]   ;;  %432 = vset.pattern.permute.xlu1 %v587_v20 }
  0x24   :  { %412 = vmatpush3.bf16.msra.mxu0 %v436_v2  ;;  %v457_v17 = vld [vmem:[#allocation5 + $0x10] ss:$8 sps:$4 sm:$0xff]   ;;  %v458_v18 = vld [vmem:[#allocation5 + $0x4] ss:$8 sps:$4 sm:$0xff]   ;;  %v460_v19 = vld [vmem:[#allocation5] ss:$8 sps:$4 sm:$0xff]  }
  0x25   :  { %238 = vmatpush1.bf16.msra.mxu1 %v442_v7  ;;  %v386_v21 = vld [vmem:[%s670_s2] ss:$0 sm:$0xff]  ;;  %v588_v29 = vmov 1   ;;  %v146_v31 = vshrl.u32 %v145_v30, 7  ;;  %s589_s23 = smov 1  }
  0x26   :  { %239 = vmatprep.subr.bf16.mxu1 %v443_v8  ;;  %433 = vset.pattern.permute.xlu0 %v588_v29  ;;  %v143_v33 = vld [vmem:[%s672_s4] sm:$0x3]  ;;  %s590_s4 = smov 127  }
  0x27   :  { %414 = vmatmul.mubr.msk.bf16.vlgmr.msra.gmra.mxu0 %vm81_vm1, %v57_v6  ;;  %v147_v32 = vsub.s32 0, %v146_v31  ;;  %v151_v34 = vsub.s32 1, %v146_v31  ;;  %v294_v44 = vld [vmem:[%s673_s5] sm:$0xff]  ;;  %s591_s5 = smov [#allocation7]  }
  0x28   :  { %s349_s24 = sshll.u32 %s591_s5, 4  ;;  %s350_s24 = int_to_ptr.vmem [resolvable:$true] %s349_s24 }
  0x29   :  { %240 = vmatpush1.bf16.msra.mxu1 %v445_v9  ;;  %v148_v35 = vrot.slane %v143_v33, %v147_v32  ;;  %v152_v36 = vrot.slane %v143_v33, %v151_v34  ;;  %s511_s25 = scalar_lea.vmem %s350_s24, 64  ;;  %p516_p11 = scmp.lt.s32.totalorder %s350_s24, %s350_s24 }
  0x2a   :  { %241 = vmatprep.subr.bf16.mxu1 %v446_v10  ;;  %p512_p10 = scmp.ne.s32.totalorder %s350_s24, %s511_s25  ;;  %p517_p12 = scmp.lt.s32.totalorder %s511_s25, %s511_s25 }
  0x2c   :  { %p518_p13 = por %p517_p12, %p516_p11 }
  0x2d   :  { %242 = vmatpush1.bf16.msra.mxu1 %v448_v11 }
  0x2e   :  { %243 = vmatprep.subr.bf16.mxu1 %v449_v12  ;;  %p519_p0 = pnand %p518_p13, %p512_p10 }
  0x31   :  { %244 = vmatpush1.bf16.msra.mxu1 %v451_v13 }
  0x32   :  { %245 = vmatprep.subr.bf16.mxu1 %v452_v14 }
  0x35   :  { %246 = vmatpush1.bf16.msra.mxu1 %v454_v15 }
  0x36   :  { %247 = vmatprep.subr.bf16.mxu1 %v455_v16 }
  0x39   :  { %248 = vmatpush1.bf16.msra.mxu1 %v457_v17 }
  0x3a   :  { %249 = vmatprep.subr.bf16.mxu1 %v458_v18 }
  0x3d   :  { %250 = vmatpush1.bf16.msra.mxu1 %v460_v19 }
  0xe7   :  { %v119_v22 = vpop.f32.mrf.mxu0 }
  0xe8   :  { %v120_v23 = vadd.f32 %v386_v21, %v119_v22 }
  0xe9   :  { %v415_v24 = vpop.f32.mrf.mxu0 }
  0xea   :  { %v125_v25 = vmax.f32 %v120_v23, 0.0 }
  0xeb   :  { %v122_v26 = vpop.f32.mrf.mxu0 }
  0xec   :  { %v126_v27 = vpack.c.bf16 %v125_v25, %v125_v25 }
  0xed   :  { %v416_v28 = vpop.f32.mrf.mxu0 }
  0xee   :  { %268 = vmatmul.mubr.bf16.vlgmr.msra.gmra.mxu1 %v126_v27 }
 0x1ae   :  { %v269_v37 = vpop.f32.mrf.mxu1 }
 0x1af   :  { %v270_v38 = vadd.f32 %v269_v37, %v148_v35 }
 0x1b0   :  { %v271_v39 = vpop.f32.mrf.mxu1 }
 0x1b1   :  { %v272_v40 = vadd.f32 %v271_v39, %v152_v36  ;;  %276 = vmax.xlane.f32.xlu0 %v270_v38 }
 0x1b2   :  { %v273_v41 = vpop.f32.mrf.mxu1 }
 0x1b3   :  { %v284_v43 = vmul.f32 1.442695, %v272_v40 }
 0x1b4   :  { %v274_v42 = vpop.f32.mrf.mxu1 }
 0x1b5   :  { %461 = vpow2.f32 %v284_v43 }
 0x1c2   :  { %v462_v45 = vpop.eup %461 }
 0x1c3   :  { %v286_v46 = vadd.f32 0.0001, %v462_v45 }
 0x1c5   :  { %vm289_vm2 = vcmp.eq.f32.partialorder %v286_v46, inf  ;;  %v292_v54 = vand.u32 2147483648, %v286_v46  ;;  %vm291_vm3 = vcmp.eq.f32.partialorder %v286_v46, 0.0 }
 0x1c7   :  { %296 = vrot.lane.b32.xlu0 %v294_v44, %s589_s23 }
 0x1cb   :  { %332 = vperm.xlu0 %433, %v286_v46  }
 0x1cf   :  { %434 = vset.pattern.permute.xlu0 %v587_v20 }
 0x23a   :  { %v277_v47 = vpop.xlane.xlu0 %276 }
 0x23b   :  { %v278_v48 = vsub.f32 %v270_v38, %v277_v47 }
 0x23d   :  { %v279_v49 = vmul.f32 1.442695, %v278_v48 }
 0x23e   :  { %v297_v55 = vpop.permute.xlu0 %296 }
 0x23f   :  { %463 = vpow2.f32 %v279_v49 }
 0x240   :  { %465 = vrsqrt.f32 %v286_v46 }
 0x24c   :  { %v464_v50 = vpop.eup %463 }
 0x24d   :  { %281 = vadd.xlane.f32.xlu1 %v464_v50  ;;  %v466_v51 = vpop.eup %465 }
 0x24e   :  { %v288_v52 = vmul.f32 %v466_v51, %v286_v46 }
 0x250   :  { %v290_v53 = vsel %vm289_vm2, %v286_v46, %v288_v52 }
 0x251   :  { %v293_v56 = vsel %vm291_vm3, %v292_v54, %v290_v53 }
 0x252   :  { %v299_v57 = vmul.f32 %v297_v55, %v293_v56 }
 0x25e   :  { %301 = vrot.lane.b32.xlu1 %v299_v57, %s590_s4 }
 0x2d6   :  { %v282_v58 = vpop.xlane.xlu1 %281 }
 0x2d7   :  { %467 = vrcp.f32 %v282_v58 }
 0x2da   :  { %v302_v59 = vpop.permute.xlu1 %301 }
 0x2db   :  { %v304_v60 = vadd.f32 %v302_v59, %v272_v40 }
 0x2dd   :  { %v308_v61 = vmul.f32 1.442695, %v304_v60  ;;  %326 = vperm.xlu1 %432, %v304_v60  }
 0x2df   :  { %469 = vpow2.f32 %v308_v61 }
 0x2e4   :  { %v468_v62 = vpop.eup %467 }
 0x2e5   :  { %v305_v63 = vmul.f32 %v468_v62, %v464_v50 }
 0x2e7   :  { %v306_v0 = vpack.c.bf16 %v305_v63, %v305_v63 }
 0x2e9   :  { %307 = vst [vmem:[#allocation7] sm:$0xf] %v306_v0 }
 0x2ec   :  { %v470_v1 = vpop.eup %469 }
 0x2ed   :  { %v310_v2 = vmul.f32 %v470_v1, %v468_v62 }
 0x2ef   :  { %313 = vperm.xlu1 %432, %v310_v2  }
 0x2f0   :  { %522 = shalt.err (!%p519_p0)
}
 0x2f1   :  { %352 = dma.vmem_to_hbm [thread:$0]  %s350_s24, 64, %s674_s6, [#allocation4]   ;;  %v320_v3 = vand.u32 127, %v145_v30  ;;  %v333_v8 = vpop.permute.xlu0 %332 }
 0x2f2   :  { %s592_s28 = smov [#allocation8]   ;;  %s593_s30 = smov [#allocation10]  }
 0x2f3   :  { %338 = vperm.xlu1 %432, %v272_v40   ;;  %vm323_vm4 = vcmp.eq.s32.totalorder %v320_v3, 2  ;;  %s359_s29 = sshll.u32 %s592_s28, 4  ;;  %vm322_vm5 = vcmp.eq.s32.totalorder %v320_v3, 1  ;;  %s369_s9 = sshll.u32 %s593_s30, 4  ;;  %vm321_vm6 = vcmp.eq.s32.totalorder %v320_v3, 0  ;;  %s360_s29 = int_to_ptr.vmem [resolvable:$true] %s359_s29  ;;  %s370_s9 = int_to_ptr.vmem [resolvable:$true] %s369_s9 }
 0x2f4   :  { %s531_s6 = scalar_lea.vmem %s360_s29, 64  ;;  %p536_p2 = scmp.lt.s32.totalorder %s360_s29, %s360_s29 }
 0x2f5   :  { %p532_p1 = scmp.ne.s32.totalorder %s360_s29, %s531_s6  ;;  %p537_p3 = scmp.lt.s32.totalorder %s531_s6, %s531_s6 }
 0x2f7   :  { %p538_p4 = por %p537_p3, %p536_p2 }
 0x2f9   :  { %p539_p5 = pnand %p538_p4, %p532_p1 }
 0x358   :  { %v327_v4 = vpop.permute.xlu1 %326 }
 0x359   :  { %v329_v6 = vsel %vm323_vm4, %v327_v4, 0.0 }
 0x35a   :  { %v335_v10 = vsel %vm322_vm5, %v333_v8, %v329_v6 }
 0x36a   :  { %v314_v5 = vpop.permute.xlu1 %313 }
 0x36b   :  { %v316_v7 = vmul.f32 %v464_v50, %v314_v5 }
 0x36d   :  { %v317_v9 = vpack.c.bf16 %v316_v7, %v316_v7 }
 0x36e   :  { %v339_v11 = vpop.permute.xlu1 %338 }
 0x36f   :  { %318 = vst [vmem:[#allocation8] sm:$0xf] %v317_v9  ;;  %v341_v12 = vsel %vm321_vm6, %v339_v11, %v335_v10 }
 0x370   :  { %342 = vst [vmem:[#allocation10] sm:$0xff] %v341_v12 }
 0x371   :  { %542 = shalt.err (!%p539_p5)
}
 0x372   :  { %362 = dma.vmem_to_hbm [thread:$0]  %s360_s29, 64, %s675_s7, [#allocation9]  }
 0x373   :  { %s551_s12 = scalar_lea.vmem %s370_s9, 128  ;;  %p556_p7 = scmp.lt.s32.totalorder %s370_s9, %s370_s9 }
 0x374   :  { %p552_p6 = scmp.ne.s32.totalorder %s370_s9, %s551_s12  ;;  %p557_p8 = scmp.lt.s32.totalorder %s551_s12, %s551_s12 }
 0x376   :  { %p558_p9 = por %p557_p8, %p556_p7 }
 0x378   :  { %p559_p10 = pnand %p558_p9, %p552_p6 }
 0x37a   :  { %562 = shalt.err (!%p559_p10)
}
 0x37b   :  { %372 = dma.vmem_to_hbm [thread:$0]  %s370_s9, 128, %s676_s8, [#allocation9]  }
 0x37c   :  { %575 = dma.done.wait [#allocation4], 64  }
 0x37d   :  { %576 = vsyncadd [#allocation4], 4294967232 }
 0x37e   :  { %577 = dma.done.wait [#allocation9], 192  }
 0x37f   :  { %578 = vsyncadd [#allocation9], 4294967104 }
 0x380   :  { %382 = vsyncpa [#allocation3], 1 }
 0x381   :  { %383 = vsyncpa [#allocation6], 1 }
 0x382   :  { %384 = vsyncpa [#allocation4], 1 }
 0x383   :  { %385 = vsyncpa [#allocation9], 1 }

</bundles_post_ra>
